<compile_context>
chip_gen: v6e
topology: v6e:2x2x1
jax: 0.10.0
libtpu: 0.0.40
codegen_flags: <defaults>
</compile_context>

<pallas_src>
import functools

import jax
import jax.numpy as jnp
from jax.experimental import pallas as pl
from jax.experimental.pallas import tpu as pltpu


def _round_up(n, m):
    return ((n + m - 1) // m) * m


def _sublanes_for(dtype):
    """Sublane packing factor: f32 -> 8, bf16/f16 -> 16, int8/fp8 -> 32."""
    return max(8, 32 // jnp.dtype(dtype).itemsize)


def _vmem_capacity_bytes():
    """Physical per-core VMEM (128 MiB v5e/v6e, 64 MiB v7x); safe fallback."""
    try:
        return int(pltpu.get_tpu_info().vmem_capacity_bytes)
    except Exception:
        return 64 * 1024 * 1024


def _dice_partial_kernel(x_ref, y_ref, acc_ref, *, hw, tile_hw, do_softmax,
                         need_mask):
    """Accumulate per-class sum(x*y), sum(x*x), sum(y*y) for one batch group.

    x_ref, y_ref : (Bt, C, tile_hw) blocks of score / target (native dtype).
    acc_ref      : (3, C, 1) f32 partial accumulator for this batch group.
                   row 0 = intersect, row 1 = z_sum (x*x), row 2 = y_sum (y*y).
    """
    ti = pl.program_id(1)

    @pl.when(ti == 0)
    def _():
        acc_ref[...] = jnp.zeros_like(acc_ref)

    x = x_ref[...].astype(jnp.float32)  # (Bt, C, tile_hw)
    y = y_ref[...].astype(jnp.float32)  # (Bt, C, tile_hw)

    if need_mask:
        lane = jax.lax.broadcasted_iota(jnp.int32, x.shape, 2)
        mask = (ti * tile_hw + lane) < hw
        x = jnp.where(mask, x, 0.0)
        y = jnp.where(mask, y, 0.0)

    if do_softmax:
        # Softmax over the class (sublane) axis, fused into the streaming pass.
        m = jnp.max(x, axis=1, keepdims=True)
        e = jnp.exp(x - m)
        s = jnp.sum(e, axis=1, keepdims=True)
        # One reciprocal per lane + C broadcast multiplies (exact, preserves
        # the 1e-4 self-test tolerance) instead of C divides per lane.
        x = e * pl.reciprocal(s, approx=False)
        if need_mask:
            x = jnp.where(mask, x, 0.0)

    # Lane reduce per (batch-row, class), then fold the small batch axis.
    pxy = jnp.sum(jnp.sum(x * y, axis=-1, keepdims=True), axis=0)  # (C, 1)
    pxx = jnp.sum(jnp.sum(x * x, axis=-1, keepdims=True), axis=0)  # (C, 1)
    pyy = jnp.sum(jnp.sum(y * y, axis=-1, keepdims=True), axis=0)  # (C, 1)

    acc_ref[0] += pxy
    acc_ref[1] += pxx
    acc_ref[2] += pyy


@functools.partial(jax.jit, static_argnames=("n_classes", "softmax", "tile_hw"))
def dice_loss(inputs, target, n_classes, weight=None, softmax=False,
              tile_hw=None):
    """Pallas equivalent of DiceLoss.forward(inputs, target, weight, softmax)."""
    assert inputs.shape == target.shape, "predict & target shape do not match"
    B, C, H, W = inputs.shape
    assert C == n_classes
    hw = H * W

    # Free, contiguous views — no transpose, no pad, no dtype upcast in HBM.
    x = inputs.reshape(B, C, hw)
    y = target.reshape(B, C, hw)

    # ---- generation-aware VMEM budget & tile sizing -----------------------
    vmem_cap = _vmem_capacity_bytes()
    budget = vmem_cap // 2  # ~64 MiB on v5e/v6e, ~32 MiB on v7x
    # Per-lane VMEM for a (1, C, lanes) step: double-buffered inputs at their
    # sublane-PADDED class count, plus ~4 tile-sized f32 temporaries.
    c_pad_x = _round_up(C, _sublanes_for(x.dtype))
    c_pad_y = _round_up(C, _sublanes_for(y.dtype))
    c_pad_f32 = _round_up(C, 8)
    bytes_per_lane = (2 * (c_pad_x * x.dtype.itemsize
                           + c_pad_y * y.dtype.itemsize)
                      + 4 * c_pad_f32 * 4)
    max_lanes = max(128, budget // bytes_per_lane)

    if tile_hw is not None:
        # Explicit override: tile the spatial axis, one batch element per step.
        bt = 1
        tile = int(tile_hw)
        assert tile % 128 == 0 or tile >= hw, "tile_hw must be 128-aligned"
        tile = min(tile, _round_up(hw, 128))
    elif hw <= max_lanes:
        # Whole image(s) per step: batch elements to amortize per-step
        # overhead, but keep >= 2 batch groups when possible so the leading
        # "parallel" axis can be sharded across v7x's two TensorCores.
        tile = hw
        bt_cap = max(1, min(max_lanes // hw, max(1, B // 2)))
        bt = 1
        for d in range(1, B + 1):
            if B % d == 0 and d <= bt_cap:
                bt = d
    else:
        # Large images: one element per step, big 128-aligned spatial tiles.
        bt = 1
        tile = max(128, (max_lanes // 128) * 128)
        tile = min(tile, _round_up(hw, 128))

    num_t = -(-hw // tile)
    n_groups = B // bt
    need_mask = (hw % tile) != 0

    kernel = functools.partial(
        _dice_partial_kernel,
        hw=hw,
        tile_hw=tile,
        do_softmax=bool(softmax),
        need_mask=need_mask,
    )

    in_spec = pl.BlockSpec((bt, C, tile), lambda g, t: (g, 0, t))
    # Per-batch-group partial accumulator: no block is shared across the
    # parallel axis, so sharding across TensorCores is race-free.
    out_spec = pl.BlockSpec((3, C, 1), lambda g, t: (g, 0, 0))

    sums = pl.pallas_call(
        kernel,
        out_shape=jax.ShapeDtypeStruct((3 * n_groups, C, 1), jnp.float32),
        grid_spec=pltpu.PrefetchScalarGridSpec(
            num_scalar_prefetch=0,
            grid=(n_groups, num_t),
            in_specs=[in_spec, in_spec],
            out_specs=out_spec,
        ),
        compiler_params=pltpu.CompilerParams(
            dimension_semantics=("parallel", "arbitrary"),
            vmem_limit_bytes=int(min(vmem_cap, budget + (16 << 20))),
        ),
    )(x, y)

    per_group = sums.reshape(n_groups, 3, C)
    total = jnp.sum(per_group, axis=0)  # (3, C)
    inter, zsum, ysum = total[0], total[1], total[2]

    smooth = 1e-10
    # per-class dice loss: 1 - (2*intersect + smooth) / (z_sum + y_sum + smooth)
    dice = 1.0 - (2.0 * inter + smooth) / (zsum + ysum + smooth)

    if weight is None:
        w = jnp.ones((C,), dtype=jnp.float32)
    else:
        w = jnp.asarray(weight, dtype=jnp.float32)

    return jnp.sum(dice * w) / n_classes


def _reference_dice_loss(inputs, target, n_classes, weight=None, softmax=False):
    """Plain-JAX reference mirroring the PyTorch module, for validation."""
    inputs = inputs.astype(jnp.float32)
    target = target.astype(jnp.float32)
    if softmax:
        inputs = jax.nn.softmax(inputs, axis=1)
    if weight is None:
        weight = [1.0] * n_classes
    smooth = 1e-10
    loss = 0.0
    for i in range(n_classes):
        s = inputs[:, i]
        t = target[:, i]
        intersect = jnp.sum(s * t)
        y_sum = jnp.sum(t * t)
        z_sum = jnp.sum(s * s)
        loss += (1.0 - (2.0 * intersect + smooth) / (z_sum + y_sum + smooth)) \
            * weight[i]
    return loss / n_classes


def _make_inputs(key, B, C, H, W, dtype):
    k_logits, k_labels = jax.random.split(key)
    logits = jax.random.normal(k_logits, (B, C, H, W), dtype=jnp.float32)
    labels = jax.random.randint(k_labels, (B, H, W), 0, C)
    target = jnp.transpose(
        jax.nn.one_hot(labels, C, dtype=jnp.float32), (0, 3, 1, 2)
    )
    return logits.astype(dtype), target.astype(dtype)


if __name__ == "__main__":
    key = jax.random.PRNGKey(0)
    k1, k2, k3 = jax.random.split(key, 3)

    # Case 1: f32, aligned spatial dims, fused softmax, no weights.
    B, C, H, W = 2, 4, 16, 16
    logits, target = _make_inputs(k1, B, C, H, W, jnp.float32)
    loss = jax.block_until_ready(
        dice_loss(logits, target, n_classes=C, softmax=True))
    ref = jax.block_until_ready(
        _reference_dice_loss(logits, target, n_classes=C, softmax=True))
    assert jnp.allclose(loss, ref, rtol=1e-4, atol=1e-6), (loss, ref)

    # Case 2: bf16 storage, ragged H*W (full-image block), class weights.
    B2, C2, H2, W2 = 2, 4, 13, 11
    w = [0.5, 1.0, 2.0, 1.5]
    logits2, target2 = _make_inputs(k2, B2, C2, H2, W2, jnp.bfloat16)
    loss2 = jax.block_until_ready(
        dice_loss(logits2, target2, n_classes=C2, weight=w, softmax=True))
    ref2 = jax.block_until_ready(
        _reference_dice_loss(logits2, target2, n_classes=C2, weight=w,
                             softmax=True))
    assert jnp.allclose(loss2, ref2, rtol=1e-4, atol=1e-6), (loss2, ref2)

    # Case 3: force the spatial-tiled + tail-mask path (tile_hw override).
    loss3 = jax.block_until_ready(
        dice_loss(logits2, target2, n_classes=C2, weight=w, softmax=True,
                  tile_hw=128))
    assert jnp.allclose(loss3, ref2, rtol=1e-4, atol=1e-6), (loss3, ref2)

    print("KERNEL_OK")
</pallas_src>

<mosaic_0001>
module attributes {stable_mosaic.version = 11 : i64} {
  func.func @_dice_partial_kernel(%arg0: i32, %arg1: i32, %arg2: memref<1x4x256xf32, #tpu.memory_space<vmem>>, %arg3: memref<1x4x256xf32, #tpu.memory_space<vmem>>, %arg4: memref<3x4x1xf32, #tpu.memory_space<vmem>>) attributes {dimension_semantics = [#tpu.dimension_semantics<parallel>, #tpu.dimension_semantics<arbitrary>], iteration_bounds = array<i64: 2, 1>, scalar_prefetch = 0 : i64, scratch_operands = 0 : i64, tpu.core_type = #tpu.core_type<tc>, window_params = [{transform_indices = @transform_0, window_bounds = array<i64: 1, 4, 256>}, {transform_indices = @transform_1, window_bounds = array<i64: 1, 4, 256>}, {transform_indices = @transform_2, window_bounds = array<i64: 3, 4, 1>}]} {
    %c0_i32 = arith.constant 0 : i32
    %0 = arith.cmpi eq, %arg1, %c0_i32 : i32
    %1 = arith.extui %0 : i1 to i32
    %c0_i32_0 = arith.constant 0 : i32
    %2 = arith.cmpi ne, %1, %c0_i32_0 : i32
    scf.if %2 {
      %cst_29 = arith.constant 0.000000e+00 : f32
      %45 = vector.broadcast %cst_29 : f32 to vector<3x4x1xf32>
      %c0_30 = arith.constant 0 : index
      %c0_31 = arith.constant 0 : index
      %c0_32 = arith.constant 0 : index
      %46 = vector.load %arg4[%c0_30, %c0_31, %c0_32] : memref<3x4x1xf32, #tpu.memory_space<vmem>>, vector<3x4x1xf32>
      tpu.vector_store %arg4[%c0_30, %c0_31, %c0_32], %45 {strides = array<i32>} : memref<3x4x1xf32, #tpu.memory_space<vmem>>, vector<3x4x1xf32>,
    } else {
    }
    %c0 = arith.constant 0 : index
    %c0_1 = arith.constant 0 : index
    %c0_2 = arith.constant 0 : index
    %3 = vector.load %arg2[%c0, %c0_1, %c0_2] : memref<1x4x256xf32, #tpu.memory_space<vmem>>, vector<1x4x256xf32>
    %c0_3 = arith.constant 0 : index
    %c0_4 = arith.constant 0 : index
    %c0_5 = arith.constant 0 : index
    %4 = vector.load %arg3[%c0_3, %c0_4, %c0_5] : memref<1x4x256xf32, #tpu.memory_space<vmem>>, vector<1x4x256xf32>
    %cst = arith.constant dense<0xFF800000> : vector<1x256xf32>
    %5 = vector.multi_reduction <maximumf>, %3, %cst [1] : vector<1x4x256xf32> to vector<1x256xf32>
    %6 = vector.shape_cast %5 : vector<1x256xf32> to vector<1x1x256xf32>
    %7 = vector.broadcast %6 : vector<1x1x256xf32> to vector<1x4x256xf32>
    %8 = arith.subf %3, %7 : vector<1x4x256xf32>
    %9 = math.exp %8 : vector<1x4x256xf32>
    %cst_6 = arith.constant dense<0.000000e+00> : vector<1x256xf32>
    %10 = vector.multi_reduction <add>, %9, %cst_6 [1] : vector<1x4x256xf32> to vector<1x256xf32>
    %11 = vector.shape_cast %10 : vector<1x256xf32> to vector<1x1x256xf32>
    %12 = tpu.reciprocal %11 : vector<1x1x256xf32> -> vector<1x1x256xf32>
    %13 = vector.broadcast %12 : vector<1x1x256xf32> to vector<1x4x256xf32>
    %14 = arith.mulf %9, %13 : vector<1x4x256xf32>
    %15 = arith.mulf %14, %4 : vector<1x4x256xf32>
    %cst_7 = arith.constant dense<0.000000e+00> : vector<1x4xf32>
    %16 = vector.multi_reduction <add>, %15, %cst_7 [2] : vector<1x4x256xf32> to vector<1x4xf32>
    %17 = vector.shape_cast %16 : vector<1x4xf32> to vector<1x4x1xf32>
    %cst_8 = arith.constant dense<0.000000e+00> : vector<4x1xf32>
    %18 = vector.multi_reduction <add>, %17, %cst_8 [0] : vector<1x4x1xf32> to vector<4x1xf32>
    %19 = arith.mulf %14, %14 : vector<1x4x256xf32>
    %cst_9 = arith.constant dense<0.000000e+00> : vector<1x4xf32>
    %20 = vector.multi_reduction <add>, %19, %cst_9 [2] : vector<1x4x256xf32> to vector<1x4xf32>
    %21 = vector.shape_cast %20 : vector<1x4xf32> to vector<1x4x1xf32>
    %cst_10 = arith.constant dense<0.000000e+00> : vector<4x1xf32>
    %22 = vector.multi_reduction <add>, %21, %cst_10 [0] : vector<1x4x1xf32> to vector<4x1xf32>
    %23 = arith.mulf %4, %4 : vector<1x4x256xf32>
    %cst_11 = arith.constant dense<0.000000e+00> : vector<1x4xf32>
    %24 = vector.multi_reduction <add>, %23, %cst_11 [2] : vector<1x4x256xf32> to vector<1x4xf32>
    %25 = vector.shape_cast %24 : vector<1x4xf32> to vector<1x4x1xf32>
    %cst_12 = arith.constant dense<0.000000e+00> : vector<4x1xf32>
    %26 = vector.multi_reduction <add>, %25, %cst_12 [0] : vector<1x4x1xf32> to vector<4x1xf32>
    %c0_13 = arith.constant 0 : index
    %c0_14 = arith.constant 0 : index
    %c0_15 = arith.constant 0 : index
    %27 = vector.load %arg4[%c0_13, %c0_14, %c0_15] : memref<3x4x1xf32, #tpu.memory_space<vmem>>, vector<1x4x1xf32>
    %28 = vector.shape_cast %27 : vector<1x4x1xf32> to vector<4x1xf32>
    %29 = arith.addf %28, %18 : vector<4x1xf32>
    %c0_16 = arith.constant 0 : index
    %c0_17 = arith.constant 0 : index
    %c0_18 = arith.constant 0 : index
    %30 = vector.load %arg4[%c0_16, %c0_17, %c0_18] : memref<3x4x1xf32, #tpu.memory_space<vmem>>, vector<1x4x1xf32>
    %31 = vector.shape_cast %30 : vector<1x4x1xf32> to vector<4x1xf32>
    %32 = vector.shape_cast %29 : vector<4x1xf32> to vector<1x4x1xf32>
    tpu.vector_store %arg4[%c0_16, %c0_17, %c0_18], %32 {strides = array<i32>} : memref<3x4x1xf32, #tpu.memory_space<vmem>>, vector<1x4x1xf32>,
    %c1 = arith.constant 1 : index
    %c0_19 = arith.constant 0 : index
    %c0_20 = arith.constant 0 : index
    %33 = vector.load %arg4[%c1, %c0_19, %c0_20] : memref<3x4x1xf32, #tpu.memory_space<vmem>>, vector<1x4x1xf32>
    %34 = vector.shape_cast %33 : vector<1x4x1xf32> to vector<4x1xf32>
    %35 = arith.addf %34, %22 : vector<4x1xf32>
    %c1_21 = arith.constant 1 : index
    %c0_22 = arith.constant 0 : index
    %c0_23 = arith.constant 0 : index
    %36 = vector.load %arg4[%c1_21, %c0_22, %c0_23] : memref<3x4x1xf32, #tpu.memory_space<vmem>>, vector<1x4x1xf32>
    %37 = vector.shape_cast %36 : vector<1x4x1xf32> to vector<4x1xf32>
    %38 = vector.shape_cast %35 : vector<4x1xf32> to vector<1x4x1xf32>
    tpu.vector_store %arg4[%c1_21, %c0_22, %c0_23], %38 {strides = array<i32>} : memref<3x4x1xf32, #tpu.memory_space<vmem>>, vector<1x4x1xf32>,
    %c2 = arith.constant 2 : index
    %c0_24 = arith.constant 0 : index
    %c0_25 = arith.constant 0 : index
    %39 = vector.load %arg4[%c2, %c0_24, %c0_25] : memref<3x4x1xf32, #tpu.memory_space<vmem>>, vector<1x4x1xf32>
    %40 = vector.shape_cast %39 : vector<1x4x1xf32> to vector<4x1xf32>
    %41 = arith.addf %40, %26 : vector<4x1xf32>
    %c2_26 = arith.constant 2 : index
    %c0_27 = arith.constant 0 : index
    %c0_28 = arith.constant 0 : index
    %42 = vector.load %arg4[%c2_26, %c0_27, %c0_28] : memref<3x4x1xf32, #tpu.memory_space<vmem>>, vector<1x4x1xf32>
    %43 = vector.shape_cast %42 : vector<1x4x1xf32> to vector<4x1xf32>
    %44 = vector.shape_cast %41 : vector<4x1xf32> to vector<1x4x1xf32>
    tpu.vector_store %arg4[%c2_26, %c0_27, %c0_28], %44 {strides = array<i32>} : memref<3x4x1xf32, #tpu.memory_space<vmem>>, vector<1x4x1xf32>,
    return
  }
  func.func @transform_0(%arg0: i32, %arg1: i32) -> (i32, i32, i32) {
    %c0_i32 = arith.constant 0 : i32
    %c0_i32_0 = arith.constant 0 : i32
    return %arg0, %c0_i32, %arg1 : i32, i32, i32
  }
  func.func @transform_1(%arg0: i32, %arg1: i32) -> (i32, i32, i32) {
    %c0_i32 = arith.constant 0 : i32
    %c0_i32_0 = arith.constant 0 : i32
    return %arg0, %c0_i32, %arg1 : i32, i32, i32
  }
  func.func @transform_2(%arg0: i32, %arg1: i32) -> (i32, i32, i32) {
    %c0_i32 = arith.constant 0 : i32
    %c0_i32_0 = arith.constant 0 : i32
    %c0_i32_1 = arith.constant 0 : i32
    return %arg0, %c0_i32, %c0_i32_0 : i32, i32, i32
  }
}

</mosaic_0001>

<bundles_post_ra>
// kernel: dice_loss.1
= control target key start
LH: loop header
LB: loop body
LE: loop exit
PB: predicated region body
PF: predicated region fallthrough
CT: control target
= control target key end

     0   :  { %s489_s9 = smov 0   ;;  %s491_s10 = smov 0   ;;  %s552_s0 = inlined_call_operand.vmem [shape: f32[2,4,256], index: 0, kind: input, shape index: {}]   ;;  %s553_s1 = inlined_call_operand.vmem [shape: f32[2,4,256], index: 1, kind: input, shape index: {}]   ;;  %s554_s2 = inlined_call_operand.vmem [shape: f32[6,4,1], index: 2, kind: output, shape index: {}]  }
   0x1   :  { %s493_s11 = smov 0  }
   0x2 LB: > { %s24_s12 = sadd.s32 1, %s467_s10  ;;  %p403_p0 = scmp.ge.s32.totalorder %s471_s11, 1  ;;  %s471_s11 = sphi %s493_s11, %s12_s11   ;;  %s467_s10 = sphi %s491_s10, %s556_s10   ;;  %s463_s9 = sphi %s489_s9, %s555_s9  }
   0x3   : > { %p26_p1 = scmp.ge.s32.totalorder %s24_s12, 2  ;;  %p148_p2 = scmp.lt.s32.totalorder %s471_s11, 3 }
   0x5   : > { %s558_s12 = smov (%p26_p1, %s24_s12), 0  ;;  %p149_p3 = pnand %p403_p0, %p148_p2 }
   0x6   : > { %p184_p4 = scmp.lt.s32.totalorder (!%p149_p3), %s463_s9, 1  ;;  %s203_s13 = smul.u32 (!%p149_p3), 3, %s463_s9 }
   0x7   : > { %152 = sbr.rel (%p149_p3) target bundleno = 236 (0xec), region = 28 }
   0x8   : > { %p204_p5 = scmp.lt.s32.totalorder (!%p149_p3), %s203_s13, 5 }
   0xc   : > { %s560_s9 = smov (!%p184_p4, %s463_s9), 1  ;;  %vm222_vm0 = vcmask 1043456   ;;  %s562_s13 = smov (!%p204_p5, %s203_s13), 5  ;;  %vm213_vm1 = vcmask 3072   ;;  %v473_v11 = vmov 0.0  }
   0xd   : > { %s415_s14 = sshll.u32 %s560_s9, 3  ;;  %s408_s21 = sshll.u32 %s562_s13, 2 }
   0xe   : > { %s191_s17 = scalar_lea.vmem %s552_s0, %s415_s14  ;;  %s201_s20 = scalar_lea.vmem %s553_s1, %s415_s14 }
   0xf   : > { %v217_v0 = vld [vmem:[%s191_s17] sm:$0xff]  ;;  %s519_s24 = scalar_lea.vmem %s554_s2, %s408_s21 }
  0x10   : > { %v218_v1 = vld [vmem:[%s201_s20] sm:$0xff]  ;;  %v220_v2 = vcombine.high %v217_v0, %v217_v0  ;;  %v223_v3 = vsel %vm222_vm0, %v217_v0, -inf  ;;  %214 = vst.msk [vmem:[%s519_s24] sm:$0xf] %vm213_vm1, %v473_v11  ;;  %215 = vst.msk [vmem:[%s519_s24 + $0x4] sm:$0xf] %vm213_vm1, %v473_v11 }
  0x11   : > { %v288_v4 = vmul.f32 %v218_v1, %v218_v1  ;;  %v224_v5 = vrot.slane %v223_v3, 4  ;;  %216 = vst.msk [vmem:[%s519_s24 + $0x8] sm:$0xf] %vm213_vm1, %v473_v11 }
  0x12   : > { %v230_v6 = vsel %vm222_vm0, %v220_v2, -inf }
  0x13   : > { %v290_v7 = vcombine.high %v288_v4, %v288_v4  ;;  %v292_v8 = vsel %vm222_vm0, %v288_v4, 0.0  ;;  %v225_v9 = vmax.f32 %v223_v3, %v224_v5  ;;  %v231_v10 = vrot.slane %v230_v6, 4 }
  0x15   : > { %v293_v12 = vsel %vm222_vm0, %v290_v7, 0.0  ;;  %v226_v13 = vrot.slane %v225_v9, 2  ;;  %v232_v14 = vmax.f32 %v230_v6, %v231_v10 }
  0x16   : > { %v294_v15 = vadd.f32 %v293_v12, %v292_v8 }
  0x17   : > { %v227_v16 = vmax.f32 %v225_v9, %v226_v13  ;;  %v233_v17 = vrot.slane %v232_v14, 2  ;;  %v298_v56 = vld [vmem:[%s519_s24] sm:$0xf]  ;;  %v409_v60 = vld [vmem:[%s519_s24 + $0x4] sm:$0xf] }
  0x18   : > { %295 = vadd.xlane.f32.xlu1 %v294_v15  ;;  %v411_v63 = vld [vmem:[%s519_s24 + $0x8] sm:$0xf] }
  0x19   : > { %v228_v18 = vrot.slane %v227_v16, 1  ;;  %v234_v19 = vmax.f32 %v232_v14, %v233_v17 }
  0x1b   : > { %v229_v20 = vmax.f32 %v227_v16, %v228_v18  ;;  %v235_v21 = vrot.slane %v234_v19, 1 }
  0x1d   : > { %v236_v22 = vmax.f32 %v234_v19, %v235_v21 }
  0x1f   : > { %v239_v23 = vcombine.low %v229_v20, %v236_v22 }
  0x21   : > { %v241_v24 = vsub.f32 %v217_v0, %v239_v23 }
  0x23   : > { %v242_v25 = vmul.f32 1.442695, %v241_v24 }
  0x25   : > { %443 = vpow2.f32 %v242_v25 }
  0x32   : > { %v444_v26 = vpop.eup %443 }
  0x33   : > { %v245_v27 = vcombine.high %v444_v26, %v444_v26  ;;  %v247_v28 = vsel %vm222_vm0, %v444_v26, 0.0 }
  0x34   : > { %v248_v29 = vrot.slane %v247_v28, 4 }
  0x35   : > { %v254_v30 = vsel %vm222_vm0, %v245_v27, 0.0 }
  0x36   : > { %v249_v31 = vadd.f32 %v248_v29, %v247_v28  ;;  %v255_v32 = vrot.slane %v254_v30, 4 }
  0x38   : > { %v250_v33 = vrot.slane %v249_v31, 2  ;;  %v256_v34 = vadd.f32 %v255_v32, %v254_v30 }
  0x3a   : > { %v251_v35 = vadd.f32 %v250_v33, %v249_v31  ;;  %v257_v36 = vrot.slane %v256_v34, 2 }
  0x3c   : > { %v252_v37 = vrot.slane %v251_v35, 1  ;;  %v258_v38 = vadd.f32 %v257_v36, %v256_v34 }
  0x3e   : > { %v253_v39 = vadd.f32 %v252_v37, %v251_v35  ;;  %v259_v40 = vrot.slane %v258_v38, 1 }
  0x40   : > { %v260_v41 = vadd.f32 %v259_v40, %v258_v38  ;;  %445 = vrcp.f32 %v253_v39 }
  0x42   : > { %447 = vrcp.f32 %v260_v41 }
  0x4d   : > { %v446_v42 = vpop.eup %445 }
  0x4f   : > { %v448_v43 = vpop.eup %447 }
  0x50   : > { %v265_v44 = vcombine.low %v446_v42, %v448_v43 }
  0x52   : > { %v267_v45 = vmul.f32 %v444_v26, %v265_v44 }
  0x54   : > { %v268_v46 = vmul.f32 %v267_v45, %v218_v1  ;;  %v278_v47 = vmul.f32 %v267_v45, %v267_v45 }
  0x56   : > { %v270_v48 = vcombine.high %v268_v46, %v268_v46  ;;  %v272_v49 = vsel %vm222_vm0, %v268_v46, 0.0  ;;  %v280_v50 = vcombine.high %v278_v47, %v278_v47  ;;  %v282_v52 = vsel %vm222_vm0, %v278_v47, 0.0 }
  0x58   : > { %v273_v51 = vsel %vm222_vm0, %v270_v48, 0.0  ;;  %v283_v53 = vsel %vm222_vm0, %v280_v50, 0.0 }
  0x59   : > { %v274_v54 = vadd.f32 %v273_v51, %v272_v49  ;;  %v284_v55 = vadd.f32 %v283_v53, %v282_v52 }
  0x5b   : > { %275 = vadd.xlane.f32.xlu0 %v274_v54 }
  0x5f   : > { %285 = vadd.xlane.f32.xlu0 %v284_v55 }
  0xa1   : > { %v296_v62 = vpop.xlane.xlu1 %295 }
  0xa2   : > { %v308_v0 = vadd.f32 %v411_v63, %v296_v62 }
  0xa4   : > { %412 = vst.msk [vmem:[%s519_s24 + $0x8] sm:$0xf] %vm213_vm1, %v308_v0 }
  0xe4   : > { %v276_v57 = vpop.xlane.xlu0 %275 }
  0xe5   : > { %v299_v58 = vadd.f32 %v298_v56, %v276_v57 }
  0xe7   : > { %301 = vst.msk [vmem:[%s519_s24] sm:$0xf] %vm213_vm1, %v299_v58 }
  0xe8   : > { %v286_v59 = vpop.xlane.xlu0 %285 }
  0xe9   : > { %v304_v61 = vadd.f32 %v409_v60, %v286_v59 }
  0xeb   : > { %410 = vst.msk [vmem:[%s519_s24 + $0x4] sm:$0xf] %vm213_vm1, %v304_v61 }
  0xec PF: > { %s12_s11 = sadd.s32 1, %s471_s11   ;;  %s555_s9 = smov %s467_s10 }
  0xed   : > { %p9_p6 = scmp.ge.s32.totalorder %s12_s11, 4   ;;  %s556_s10 = smov %s558_s12 }
  0xef   :  { %11 = sbr.rel (!%p9_p6) target bundleno = 2 (0x2), region = 67 }

</bundles_post_ra>
